<compile_context>
chip_gen: v5e
topology: v5e:2x2
jax: 0.10.0
libtpu: 0.0.40
codegen_flags: <defaults>
</compile_context>

<pallas_src>
import functools
import numpy as np
import jax
import jax.numpy as jnp
from jax.experimental import pallas as pl
from jax.experimental.pallas import tpu as pltpu


def _round_up(x, m):
    return ((x + m - 1) // m) * m


# ----------------------------------------------------------------------------
# Fused matmul kernel: o = relu?( x @ w [+ x2 @ w2] [+ bias] )
# (BN scale pre-folded into w; bf16 inputs, f32 accumulation on the MXU.)
# ----------------------------------------------------------------------------
def _mm_kernel(*refs, has_x2, has_bias, relu):
    i = 0
    x_ref = refs[i]; i += 1
    w_ref = refs[i]; i += 1
    acc = jnp.dot(x_ref[...], w_ref[...], preferred_element_type=jnp.float32)
    if has_x2:
        x2_ref = refs[i]; i += 1
        w2_ref = refs[i]; i += 1
        acc = acc + jnp.dot(x2_ref[...], w2_ref[...],
                            preferred_element_type=jnp.float32)
    if has_bias:
        b_ref = refs[i]; i += 1
        acc = acc + b_ref[...]
    if relu:
        acc = jnp.maximum(acc, 0.0)
    o_ref = refs[i]
    o_ref[...] = acc.astype(o_ref.dtype)


def matmul_fused(x, w, *, x2=None, w2=None, bias=None, relu=False,
                 out_dtype=jnp.float32):
    """x:[M,K], w:[K,N] -> [M,N].  Optional split-K pair (x2:[M,K2], w2:[K2,N])
    and f32 bias:[N]."""
    M, K = x.shape
    N = w.shape[1]
    has_x2 = x2 is not None
    has_bias = bias is not None

    # M tile: multiple of 8, capped at 512, >=2 blocks when M allows so both
    # v7x TensorCores get a parallel block.
    if M >= 1024:
        tm = 512
    elif M >= 16:
        tm = _round_up(pl.cdiv(M, 2), 8)
    else:
        tm = _round_up(M, 8)
    Mp = _round_up(M, tm)
    if Mp != M:
        x = jnp.pad(x, ((0, Mp - M), (0, 0)))
        if has_x2:
            x2 = jnp.pad(x2, ((0, Mp - M), (0, 0)))

    inputs = [x, w]
    in_specs = [pl.BlockSpec((tm, K), lambda i: (i, 0)),
                pl.BlockSpec((K, N), lambda i: (0, 0))]
    if has_x2:
        K2 = x2.shape[1]
        inputs += [x2, w2]
        in_specs += [pl.BlockSpec((tm, K2), lambda i: (i, 0)),
                     pl.BlockSpec((K2, N), lambda i: (0, 0))]
    if has_bias:
        inputs.append(bias.reshape(1, N).astype(jnp.float32))
        in_specs.append(pl.BlockSpec((1, N), lambda i: (0, 0)))

    out = pl.pallas_call(
        functools.partial(_mm_kernel, has_x2=has_x2, has_bias=has_bias,
                          relu=relu),
        out_shape=jax.ShapeDtypeStruct((Mp, N), out_dtype),
        grid=(Mp // tm,),
        in_specs=in_specs,
        out_specs=pl.BlockSpec((tm, N), lambda i: (i, 0)),
        compiler_params=pltpu.CompilerParams(
            dimension_semantics=("parallel",)),
    )(*inputs)
    return out[:M] if Mp != M else out


# ----------------------------------------------------------------------------
# Fused 3x3 conv (stride 1, pad 1, no bias, BN folded, ReLU) — no im2col.
# Input is a zero-padded, row-flattened NHWC image; each of the 9 taps is a
# sublane-offset row window matmul accumulated in f32.
# ----------------------------------------------------------------------------
def _conv3x3_kernel(*refs, H, W, has_x2):
    if has_x2:
        xa_ref, wa_ref, xb_ref, wb_ref, o_ref = refs
    else:
        xa_ref, wa_ref, o_ref = refs
    L = H * (W + 2)                       # output rows incl. 2 junk cols / row
    acc = None
    for dy in range(3):
        for dx in range(3):
            start = dy * (W + 2) + dx
            pa = xa_ref[0, pl.ds(start, L), :]
            d = jnp.dot(pa, wa_ref[dy * 3 + dx],
                        preferred_element_type=jnp.float32)
            acc = d if acc is None else acc + d
            if has_x2:
                pb = xb_ref[0, pl.ds(start, L), :]
                acc = acc + jnp.dot(pb, wb_ref[dy * 3 + dx],
                                    preferred_element_type=jnp.float32)
    o_ref[0] = jnp.maximum(acc, 0.0).astype(o_ref.dtype)


def conv3x3_fused(xa, wa, xb=None, wb=None, *, out_dtype=jnp.bfloat16):
    """xa:[N,H,W,Ca] (+ optional split input group xb:[N,H,W,Cb]);
    wa:[3,3,Ca,Cout], wb:[3,3,Cb,Cout] -> [N,H,W,Cout]."""
    N, H, W, Ca = xa.shape
    Cout = wa.shape[3]
    L = H * (W + 2)
    P = (H + 2) * (W + 2) + 2             # +2 so the last shifted window fits

    def prep(x):
        xp = jnp.pad(x, ((0, 0), (1, 1), (1, 1), (0, 0)))
        xp = xp.reshape(N, (H + 2) * (W + 2), x.shape[3])
        return jnp.pad(xp, ((0, 0), (0, 2), (0, 0))).astype(jnp.bfloat16)

    has_x2 = xb is not None
    inputs = [prep(xa), wa.reshape(9, Ca, Cout).astype(jnp.bfloat16)]
    in_specs = [pl.BlockSpec((1, P, Ca), lambda n: (n, 0, 0)),
                pl.BlockSpec((9, Ca, Cout), lambda n: (0, 0, 0))]
    if has_x2:
        Cb = xb.shape[3]
        inputs += [prep(xb), wb.reshape(9, Cb, Cout).astype(jnp.bfloat16)]
        in_specs += [pl.BlockSpec((1, P, Cb), lambda n: (n, 0, 0)),
                     pl.BlockSpec((9, Cb, Cout), lambda n: (0, 0, 0))]

    out = pl.pallas_call(
        functools.partial(_conv3x3_kernel, H=H, W=W, has_x2=has_x2),
        out_shape=jax.ShapeDtypeStruct((N, L, Cout), out_dtype),
        grid=(N,),
        in_specs=in_specs,
        out_specs=pl.BlockSpec((1, L, Cout), lambda n: (n, 0, 0)),
        compiler_params=pltpu.CompilerParams(
            dimension_semantics=("parallel",)),
    )(*inputs)
    # rows are (h, w') with w' in [0, W+2); columns W, W+1 are junk -> drop.
    return out.reshape(N, H, W + 2, Cout)[:, :, :W, :]


# ----------------------------------------------------------------------------
# Separable bilinear resize (align_corners=True):
#   H axis via a small interpolation matmul, W axis via an unrolled 2-tap lerp
#   over lane-aligned column blocks.
# ----------------------------------------------------------------------------
def _interp_taps(out_size, in_size):
    lo, frac = [], []
    for o in range(out_size):
        if in_size == 1 or out_size == 1:
            src = 0.0
        else:
            src = o * (in_size - 1) / (out_size - 1)
        l = min(int(np.floor(src)), max(in_size - 2, 0))
        lo.append(l)
        frac.append(float(src - l))
    return lo, frac


def _interp_matrix(out_size, in_size):
    m = np.zeros((out_size, in_size), dtype=np.float32)
    lo, frac = _interp_taps(out_size, in_size)
    for o in range(out_size):
        m[o, lo[o]] += 1.0 - frac[o]
        m[o, min(lo[o] + 1, in_size - 1)] += frac[o]
    return jnp.asarray(m)


def _resize_kernel(ah_ref, x_ref, o_ref, *, C, Wo, w_lo, w_frac):
    # x_ref: [1, Hi, Wi*C]; ah_ref: [Ho, Hi]  -> H-axis interpolation (MXU).
    t = jnp.dot(ah_ref[...], x_ref[0], preferred_element_type=jnp.float32)
    # W-axis interpolation: 2-tap lerp per output column block (lane aligned).
    for wo in range(Wo):
        lo, f = w_lo[wo], w_frac[wo]
        left = t[:, lo * C:(lo + 1) * C]
        if f > 0.0:
            right = t[:, (lo + 1) * C:(lo + 2) * C]
            col = left * (1.0 - f) + right * f
        else:
            col = left
        o_ref[0, :, wo * C:(wo + 1) * C] = col.astype(o_ref.dtype)


def bilinear_resize(x, out_h, out_w, out_dtype=jnp.float32):
    """x:[N,H,W,C] -> [N,out_h,out_w,C]; bilinear, align_corners=True."""
    N, H, W, C = x.shape
    ah = _interp_matrix(out_h, H)
    w_lo, w_frac = _interp_taps(out_w, W)
    xf = x.reshape(N, H, W * C).astype(jnp.float32)
    out = pl.pallas_call(
        functools.partial(_resize_kernel, C=C, Wo=out_w,
                          w_lo=tuple(w_lo), w_frac=tuple(w_frac)),
        out_shape=jax.ShapeDtypeStruct((N, out_h, out_w * C), out_dtype),
        grid=(N,),
        in_specs=[pl.BlockSpec((out_h, H), lambda n: (0, 0)),
                  pl.BlockSpec((1, H, W * C), lambda n: (n, 0, 0))],
        out_specs=pl.BlockSpec((1, out_h, out_w * C), lambda n: (n, 0, 0)),
        compiler_params=pltpu.CompilerParams(
            dimension_semantics=("parallel",)),
    )(ah, xf)
    return out.reshape(N, out_h, out_w, C)


# ----------------------------------------------------------------------------
# Deterministic parameter init (kaiming-normal weights, PyTorch-style biases)
# ----------------------------------------------------------------------------
def init_params(key, num_classes, low_level_inplanes=24):
    ks = jax.random.split(key, 8)

    def kaiming(k, shape, fan_in):
        return jax.random.normal(k, shape, jnp.float32) * np.sqrt(2.0 / fan_in)

    p = {}
    p["conv1_w"] = kaiming(ks[0], (low_level_inplanes, 48), low_level_inplanes)
    p["lc1_w"] = kaiming(ks[1], (3, 3, 304, 256), 9 * 304)
    p["lc2_w"] = kaiming(ks[2], (3, 3, 256, 256), 9 * 256)
    p["head1_w"] = kaiming(ks[3], (304, num_classes), 304)
    p["head1_b"] = jax.random.uniform(ks[4], (num_classes,), jnp.float32,
                                      -1.0, 1.0) / np.sqrt(304.0)
    p["head2_w"] = kaiming(ks[5], (256, num_classes), 256)
    p["head2_b"] = jax.random.uniform(ks[6], (num_classes,), jnp.float32,
                                      -1.0, 1.0) / np.sqrt(256.0)
    return p


# ----------------------------------------------------------------------------
# Decoder forward pass
# ----------------------------------------------------------------------------
def decoder_forward(x_nchw, low_level_feat, params, num_classes,
                    multi_loss=True):
    bn_scale = float(1.0 / np.sqrt(1.0 + 1e-5))       # BN eval, default stats
    nc_pad = max(128, _round_up(num_classes, 128))    # lane-dense head outputs

    x = jnp.transpose(x_nchw, (0, 2, 3, 1)).astype(jnp.float32)        # NHWC
    ll = jnp.transpose(low_level_feat[-2], (0, 2, 3, 1)).astype(jnp.float32)
    N, H, W, Cll = ll.shape
    Cx = x.shape[-1]
    assert Cx + 48 == 304
    M = N * H * W

    # --- trace-time weight prep: fold BN scale, split K, pad heads, bf16 ---
    w1 = (params["conv1_w"] * bn_scale).astype(jnp.bfloat16)           # [Cll,48]
    lc1 = params["lc1_w"] * bn_scale                                   # [3,3,304,256]
    lc1_a, lc1_b = lc1[:, :, :Cx, :], lc1[:, :, Cx:, :]
    lc2 = params["lc2_w"] * bn_scale                                   # [3,3,256,256]

    def pad_head(w, b):
        wp = jnp.pad(w, ((0, 0), (0, nc_pad - num_classes))).astype(jnp.bfloat16)
        bp = jnp.pad(b, (0, nc_pad - num_classes)).astype(jnp.float32)
        return wp, bp

    h1w, h1b = pad_head(params["head1_w"], params["head1_b"])          # [304,128]
    h1w_a, h1w_b = h1w[:Cx], h1w[Cx:]
    h2w, h2b = pad_head(params["head2_w"], params["head2_b"])          # [256,128]

    # --- conv1 (1x1, no bias) + BN + ReLU on the low-level features ---
    llf = matmul_fused(ll.reshape(M, Cll).astype(jnp.bfloat16), w1,
                       relu=True, out_dtype=jnp.bfloat16)              # [M,48]
    llf4 = llf.reshape(N, H, W, 48)

    # --- bilinear upsample of ASPP features to the low-level size ---
    x_up = bilinear_resize(x, H, W, out_dtype=jnp.bfloat16)            # [N,H,W,Cx]
    x_up_flat = x_up.reshape(M, Cx)

    # --- head1 on the (virtual) concat [x_up ; llf]: split-K, padded lanes ---
    head1_out = None
    if multi_loss:
        h1 = matmul_fused(x_up_flat, h1w_a, x2=llf, w2=h1w_b, bias=h1b,
                          relu=False, out_dtype=jnp.float32)           # [M,128]
        head1_out = jnp.transpose(
            h1[:, :num_classes].reshape(N, H, W, num_classes), (0, 3, 1, 2))

    # --- last_conv: two fused 3x3 conv + BN + ReLU blocks (Dropout = id) ---
    y = conv3x3_fused(x_up, lc1_a, xb=llf4, wb=lc1_b,
                      out_dtype=jnp.bfloat16)                          # [N,H,W,256]
    y = conv3x3_fused(y, lc2, out_dtype=jnp.bfloat16)                  # [N,H,W,256]

    # --- head2 (1x1 + bias, padded lanes) + x4 bilinear upsample ---
    h2 = matmul_fused(y.reshape(M, 256).astype(jnp.bfloat16), h2w,
                      bias=h2b, relu=False, out_dtype=jnp.float32)     # [M,128]
    h2 = h2.reshape(N, H, W, nc_pad)
    out = bilinear_resize(h2, 4 * H, 4 * W, out_dtype=jnp.float32)     # [N,4H,4W,128]
    out_nchw = jnp.transpose(out[..., :num_classes], (0, 3, 1, 2))

    if multi_loss:
        # deque order: [upsampled head2 output, head1 output]
        return out_nchw, head1_out
    return out_nchw


if __name__ == "__main__":
    key = jax.random.PRNGKey(0)
    num_classes = 6
    kx, kl0, kl1, kp = jax.random.split(key, 4)

    # backbone='mobilenet' -> low_level_inplanes = 24
    # x is the ASPP output (256 channels) at 1/4 of the low-level resolution.
    x = jax.random.normal(kx, (2, 256, 2, 2), jnp.float32)             # NCHW
    low_level_feat = [
        jax.random.normal(kl0, (2, 24, 8, 8), jnp.float32),            # used ([-2])
        jax.random.normal(kl1, (2, 24, 4, 4), jnp.float32),
    ]
    params = init_params(kp, num_classes, low_level_inplanes=24)

    out_up, out_head1 = decoder_forward(x, low_level_feat, params,
                                        num_classes, multi_loss=True)
    jax.block_until_ready(out_up)
    jax.block_until_ready(out_head1)

    assert out_up.shape == (2, num_classes, 32, 32), out_up.shape
    assert out_head1.shape == (2, num_classes, 8, 8), out_head1.shape
    assert bool(jnp.all(jnp.isfinite(out_up)))
    assert bool(jnp.all(jnp.isfinite(out_head1)))
    print("KERNEL_OK")
</pallas_src>

<mosaic_0001>
module attributes {stable_mosaic.version = 11 : i64} {
  func.func @_mm_kernel(%arg0: i32, %arg1: memref<64x24xbf16, #tpu.memory_space<vmem>>, %arg2: memref<24x48xbf16, #tpu.memory_space<vmem>>, %arg3: memref<64x48xbf16, #tpu.memory_space<vmem>>) attributes {dimension_semantics = [#tpu.dimension_semantics<parallel>], iteration_bounds = array<i64: 2>, scalar_prefetch = 0 : i64, scratch_operands = 0 : i64, tpu.core_type = #tpu.core_type<tc>, window_params = [{transform_indices = @transform_0, window_bounds = array<i64: 64, 24>}, {pipeline_mode = #tpu.pipeline_mode<synchronous>, transform_indices = @transform_1, window_bounds = array<i64: 24, 48>}, {transform_indices = @transform_2, window_bounds = array<i64: 64, 48>}]} {
    %c0 = arith.constant 0 : index
    %c0_0 = arith.constant 0 : index
    %0 = vector.load %arg1[%c0, %c0_0] : memref<64x24xbf16, #tpu.memory_space<vmem>>, vector<64x24xbf16>
    %c0_1 = arith.constant 0 : index
    %c0_2 = arith.constant 0 : index
    %1 = vector.load %arg2[%c0_1, %c0_2] : memref<24x48xbf16, #tpu.memory_space<vmem>>, vector<24x48xbf16>
    %cst = arith.constant dense<0.000000e+00> : vector<64x48xf32>
    %2 = tpu.matmul %0, %1, %cst {dimension_numbers = #tpu.dot_dimension_numbers<[1], [0], [0], [1], [0, 0, 1, 1], [], []>} : vector<64x24xbf16>, vector<24x48xbf16>, vector<64x48xf32> -> vector<64x48xf32>
    %cst_3 = arith.constant 0.000000e+00 : f32
    %3 = vector.broadcast %cst_3 : f32 to vector<64x48xf32>
    %4 = arith.maximumf %2, %3 : vector<64x48xf32>
    %5 = arith.truncf %4 : vector<64x48xf32> to vector<64x48xbf16>
    %c0_4 = arith.constant 0 : index
    %c0_5 = arith.constant 0 : index
    %6 = vector.load %arg3[%c0_4, %c0_5] : memref<64x48xbf16, #tpu.memory_space<vmem>>, vector<64x48xbf16>
    tpu.vector_store %arg3[%c0_4, %c0_5], %5 {strides = array<i32>} : memref<64x48xbf16, #tpu.memory_space<vmem>>, vector<64x48xbf16>,
    return
  }
  func.func @transform_0(%arg0: i32) -> (i32, i32) {
    %c0_i32 = arith.constant 0 : i32
    %c0_i32_0 = arith.constant 0 : i32
    return %arg0, %c0_i32 : i32, i32
  }
  func.func @transform_1(%arg0: i32) -> (i32, i32) {
    %c0_i32 = arith.constant 0 : i32
    %c0_i32_0 = arith.constant 0 : i32
    %c0_i32_1 = arith.constant 0 : i32
    return %c0_i32, %c0_i32_0 : i32, i32
  }
  func.func @transform_2(%arg0: i32) -> (i32, i32) {
    %c0_i32 = arith.constant 0 : i32
    %c0_i32_0 = arith.constant 0 : i32
    return %arg0, %c0_i32 : i32, i32
  }
}

</mosaic_0001>

<bundles_post_ra>
// kernel: tpu_custom_call.1
= control target key start
LH: loop header
LB: loop body
LE: loop exit
PB: predicated region body
PF: predicated region fallthrough
CT: control target
= control target key end

     0   :  { %s392_s9 = smov 0   ;;  %s423_s0 = inlined_call_operand.vmem [shape: bf16[128,24], index: 0, kind: input, shape index: {}]   ;;  %s424_s1 = inlined_call_operand.vmem [shape: bf16[24,48], index: 1, kind: input, shape index: {}]   ;;  %s425_s2 = inlined_call_operand.vmem [shape: bf16[128,48], index: 2, kind: output, shape index: {}]  }
   0x1 LB: > { %s315_s10 = sadd.s32 4294967295, %s375_s9   ;;  %p319_p0 = scmp.ge.s32.totalorder %s375_s9, 1  ;;  %s375_s9 = sphi %s392_s9, %s12_s9  }
   0x2   : > { %p113_p1 = scmp.lt.s32.totalorder %s375_s9, 3 }
   0x4   : > { %p114_p2 = pnand %p319_p0, %p113_p1 }
   0x5   : > { %s320_s13 = sshll.u32 (!%p114_p2), %s315_s10, 3 }
   0x6   : > { %117 = sbr.rel (%p114_p2) target bundleno = 171 (0xab), region = 28  ;;  %p136_p3 = scmp.lt.s32.totalorder (!%p114_p2), %s320_s13, 15 }
   0xb   : > { %v158_v0 = vld [vmem:[%s424_s1 + $0x8] sm:$0xf]  ;;  %vm201_vm0 = vcmask 1043456   ;;  %s427_s13 = smov (!%p136_p3, %s320_s13), 15  ;;  %v354_v4 = vld [vmem:[%s424_s1] sm:$0xff]  ;;  %vm188_vm1 = vcmask 195584  }
   0xc   : > { %v184_v1 = vunpack.c.l.b16 %v158_v0  ;;  %s321_s14 = sshll.u32 %s427_s13, 2  ;;  %vm250_vm2 = vcmask 388096  }
   0xd   : > { %s139_s19 = scalar_lea.vmem %s423_s0, %s321_s14  ;;  %s145_s22 = scalar_lea.vmem %s425_s2, %s321_s14 }
   0xe   : > { %v186_v2 = vpack.c.b16 %v184_v1, %v184_v1  ;;  %v350_v5 = vld [vmem:[%s139_s19] sm:$0xff]  ;;  %v351_v6 = vld [vmem:[%s139_s19 + $0x8] sm:$0xff]  ;;  %v352_v7 = vld [vmem:[%s139_s19 + $0x10] sm:$0xff] }
   0xf   : > { %v353_v8 = vld [vmem:[%s139_s19 + $0x18] sm:$0xff] }
  0x10   : > { %v203_v3 = vsel %vm201_vm0, %v186_v2, 0 }
  0x11   : > { %211 = vmatpush.bf16.msra.mxu0 %v203_v3  ;;  %355 = vmatpush.bf16.msra.mxu1 %v203_v3 }
  0x12   : > { %356 = vmatpush.bf16.msra.mxu2 %v203_v3  ;;  %357 = vmatpush.bf16.msra.mxu3 %v203_v3 }
  0x15   : > { %212 = vmatpush.bf16.msra.mxu0 %v354_v4  ;;  %358 = vmatpush.bf16.msra.mxu1 %v354_v4 }
  0x16   : > { %359 = vmatpush.bf16.msra.mxu2 %v354_v4  ;;  %360 = vmatpush.bf16.msra.mxu3 %v354_v4 }
  0x18   : > { %344 = vmatmul.msk.bf16.vlgmr.msra.gmra.mxu0 %vm188_vm1, %v350_v5  ;;  %345 = vmatmul.msk.bf16.vlgmr.msra.gmra.mxu1 %vm188_vm1, %v351_v6 }
  0x19   : > { %346 = vmatmul.msk.bf16.vlgmr.msra.gmra.mxu2 %vm188_vm1, %v352_v7  ;;  %347 = vmatmul.msk.bf16.vlgmr.msra.gmra.mxu3 %vm188_vm1, %v353_v8 }
  0x95   : > { %v214_v9 = vpop.f32.mrf.mxu0  ;;  %v219_v10 = vpop.f32.mrf.mxu1 }
  0x96   : > { %v234_v11 = vmax.f32 %v214_v9, 0.0  ;;  %v236_v12 = vmax.f32 %v219_v10, 0.0 }
  0x98   : > { %v242_v13 = vpack.c.bf16 %v234_v11, %v234_v11  ;;  %v244_v14 = vpack.c.bf16 %v236_v12, %v236_v12 }
  0x9a   : > { %251 = vst.msk [vmem:[%s145_s22] sm:$0xf] %vm250_vm2, %v242_v13 }
  0x9b   : > { %253 = vst.msk [vmem:[%s145_s22 + $0x8] sm:$0xf] %vm250_vm2, %v244_v14 }
  0x9c   : > { %v224_v15 = vpop.f32.mrf.mxu2  ;;  %v229_v16 = vpop.f32.mrf.mxu3 }
  0x9d   : > { %v238_v17 = vmax.f32 %v224_v15, 0.0  ;;  %v240_v18 = vmax.f32 %v229_v16, 0.0  ;;  %v216_v19 = vpop.f32.mrf.mxu0  ;;  %v221_v20 = vpop.f32.mrf.mxu1 }
  0x9e   : > { %v235_v21 = vmax.f32 %v216_v19, 0.0  ;;  %v237_v22 = vmax.f32 %v221_v20, 0.0 }
  0x9f   : > { %v246_v23 = vpack.c.bf16 %v238_v17, %v238_v17  ;;  %v248_v24 = vpack.c.bf16 %v240_v18, %v240_v18 }
  0xa0   : > { %v243_v25 = vpack.c.bf16 %v235_v21, %v235_v21  ;;  %v245_v26 = vpack.c.bf16 %v237_v22, %v237_v22 }
  0xa1   : > { %255 = vst.msk [vmem:[%s145_s22 + $0x10] sm:$0xf] %vm250_vm2, %v246_v23 }
  0xa2   : > { %257 = vst.msk [vmem:[%s145_s22 + $0x18] sm:$0xf] %vm250_vm2, %v248_v24 }
  0xa3   : > { %252 = vst.msk [vmem:[%s145_s22 + $0x4] sm:$0xf] %vm250_vm2, %v243_v25 }
  0xa4   : > { %254 = vst.msk [vmem:[%s145_s22 + $0xc] sm:$0xf] %vm250_vm2, %v245_v26  ;;  %v226_v27 = vpop.f32.mrf.mxu2  ;;  %v231_v28 = vpop.f32.mrf.mxu3 }
  0xa5   : > { %v239_v29 = vmax.f32 %v226_v27, 0.0  ;;  %v241_v30 = vmax.f32 %v231_v28, 0.0 }
  0xa7   : > { %v247_v31 = vpack.c.bf16 %v239_v29, %v239_v29  ;;  %v249_v32 = vpack.c.bf16 %v241_v30, %v241_v30 }
  0xa9   : > { %256 = vst.msk [vmem:[%s145_s22 + $0x14] sm:$0xf] %vm250_vm2, %v247_v31 }
  0xaa   : > { %258 = vst.msk [vmem:[%s145_s22 + $0x1c] sm:$0xf] %vm250_vm2, %v249_v32 }
  0xab PF: > { %s12_s9 = sadd.s32 1, %s375_s9  }
  0xac   : > { %p9_p4 = scmp.ge.s32.totalorder %s12_s9, 4  }
  0xae   :  { %11 = sbr.rel (!%p9_p4) target bundleno = 1 (0x1), region = 58 }

</bundles_post_ra>
